<compile_context>
chip_gen: v7x
topology: tpu7x:2x2x1
jax: 0.10.0
libtpu: 0.0.40
codegen_flags: <defaults>
</compile_context>

<pallas_src>
import functools

import jax
import jax.numpy as jnp
from jax import lax
from jax.experimental import pallas as pl
from jax.experimental.pallas import tpu as pltpu


def _round_up(x, m):
    return ((x + m - 1) // m) * m


def _pick_hw_tile(hw, target=8192):
    """Spatial (lane) tile: multiple of 128, <= target, preferring exact divisors."""
    hw_ceil = _round_up(hw, 128)
    if hw_ceil <= target:
        return hw_ceil                      # single (possibly tail-padded) tile
    for t in range(target - target % 128, 127, -128):
        if hw % t == 0:
            return t                        # exact divisor: no padded pixels
    return target - target % 128            # tail tile zero-padded; bias-folded


def _pick_chunk(hw_tile, target=512):
    """In-kernel lane-chunk width: multiple of 128 that divides hw_tile, <= target."""
    if hw_tile <= target:
        return hw_tile
    for c in range(target, 127, -128):
        if hw_tile % c == 0:
            return c
    return hw_tile


def _finetune_fwd_kernel(x_ref, w1_ref, b1_ref, w2_ref, b2_ref, out_ref,
                         acc_ref, *, inv_hw, chunk):
    # x_ref:  [TB, C, HW_T]   bf16 pixel block (HW on the 128-lane axis)
    # w1_ref: [FEAT, C]       bf16 backbone 1x1-conv weight   (grid-resident)
    # b1_ref: [FEAT, 1]       f32  backbone bias               (grid-resident)
    # w2_ref: [FEAT, NCLSP]   f32  fc weight, transposed + lane-padded (resident)
    # b2_ref: [1, NCLSP]      f32  fc bias (HW-pad correction pre-folded)
    # out_ref:[TB, NCLSP]     f32  logits block (lane-dense store)
    # acc_ref:[TB, FEAT, CH]  f32  lane-wise pooled-sum accumulator
    hi = pl.program_id(1)

    @pl.when(hi == 0)
    def _init():
        acc_ref[...] = jnp.zeros_like(acc_ref)

    tb = x_ref.shape[0]
    hw_t = x_ref.shape[-1]
    n_chunks = hw_t // chunk
    feat = w1_ref.shape[0]

    w1 = w1_ref[...]                                           # bf16 MXU lhs
    # Hoisted loop-invariant broadcast (JAX does not CSE broadcast_in_dim).
    b1b = jnp.broadcast_to(b1_ref[...], (feat, chunk))         # f32

    # Fused conv + bias + ReLU + partial pool, chunked so no [TB,FEAT,HW_T]
    # intermediate ever streams through VMEM.  Per-batch-element accumulator
    # stays in vregs across the chunk loop; one VMEM add per grid step.
    for b in range(tb):                                        # static unroll
        def chunk_body(ci, acc_b, b=b):
            off = pl.multiple_of(ci * chunk, chunk)            # 128-aligned
            xb = x_ref[b, :, pl.ds(off, chunk)]                # [C, chunk] bf16
            # C -> FEAT contraction on the MXU (idle slot), f32 accumulation.
            h = jnp.dot(w1, xb, preferred_element_type=jnp.float32)
            return acc_b + jnp.maximum(h + b1b, 0.0)           # 3 VPU ops/elem
        acc_b = lax.fori_loop(0, n_chunks, chunk_body,
                              jnp.zeros((feat, chunk), jnp.float32),
                              unroll=True)
        acc_ref[b, :, :] += acc_b

    @pl.when(hi == pl.num_programs(1) - 1)
    def _finalize():
        # One cross-lane (XLU) reduce per batch tile, then the fc head as a
        # single MXU matmul with a lane-dense (128-padded) store.
        pooled = jnp.sum(acc_ref[...], axis=-1) * inv_hw       # [TB, FEAT]
        logits = jnp.dot(pooled, w2_ref[...],
                         preferred_element_type=jnp.float32)   # [TB, NCLSP]
        out_ref[...] = logits + b2_ref[...]


def finetuning_model_forward(x_nchw, w1, b1, w2, b2, *, batch_tile=8,
                             hw_tile=None, chunk=None):
    """x_nchw: [B, C, H, W] f32. Returns logits [B, NUM_CLASSES] f32."""
    B, C, H, W = x_nchw.shape
    HW = H * W
    feat_dim = w1.shape[0]          # w1: [FEAT, C]
    num_classes = w2.shape[0]       # w2: [NCLS, FEAT]

    # [B, C, HW] is a free reshape of NCHW (no host transpose); bf16 pixels
    # halve the dominant HBM->VMEM traffic.  All VPU math stays f32 in-kernel.
    x_pix = x_nchw.reshape(B, C, HW).astype(jnp.bfloat16)

    # Batch tile: never pad small batches up to 8 (TB = B keeps out/x blocks
    # equal to full array dims, legal w.r.t. the (8,128) rule; zero wasted rows).
    TB = min(batch_tile, B)
    B_pad = _round_up(B, TB)

    # Spatial tiling (reduction axis: last in grid, "arbitrary").
    if hw_tile is None:
        hw_tile = _pick_hw_tile(HW)
    assert hw_tile % 128 == 0
    if chunk is None:
        chunk = _pick_chunk(hw_tile)
    assert hw_tile % chunk == 0 and (chunk % 128 == 0 or chunk == hw_tile)
    HW_pad = _round_up(HW, hw_tile)
    n_hw_pad = HW_pad - HW

    if B_pad != B or HW_pad != HW:
        x_pix = jnp.pad(x_pix, ((0, B_pad - B), (0, 0), (0, HW_pad - HW)))

    # Parameters: bf16 conv weight (MXU), f32 bias/head; classes padded to 128
    # so the output store is lane-dense.
    ncls_pad = _round_up(num_classes, 128)
    w1b = w1.astype(jnp.bfloat16)                               # [FEAT, C]
    b1c = b1.astype(jnp.float32).reshape(feat_dim, 1)           # [FEAT, 1]
    w2f = w2.astype(jnp.float32)
    w2t = jnp.pad(w2f.T, ((0, 0), (0, ncls_pad - num_classes))) # [FEAT, NCLSP]
    b2_eff = b2.astype(jnp.float32)
    if n_hw_pad:
        # Zero-padded pixels contribute exactly relu(b1) each to the pooled
        # sum; fold the exact correction into the fc bias (no in-kernel mask).
        b2_eff = b2_eff - (n_hw_pad / HW) * (
            jnp.maximum(b1.astype(jnp.float32), 0.0) @ w2f.T)
    b2p = jnp.pad(b2_eff.reshape(1, num_classes),
                  ((0, 0), (0, ncls_pad - num_classes)))        # [1, NCLSP]

    grid = (B_pad // TB, HW_pad // hw_tile)
    kernel = functools.partial(_finetune_fwd_kernel, inv_hw=1.0 / HW,
                               chunk=chunk)

    out = pl.pallas_call(
        kernel,
        out_shape=jax.ShapeDtypeStruct((B_pad, ncls_pad), jnp.float32),
        grid_spec=pltpu.PrefetchScalarGridSpec(
            num_scalar_prefetch=0,
            grid=grid,
            in_specs=[
                pl.BlockSpec((TB, C, hw_tile), lambda bi, hi: (bi, 0, hi)),
                pl.BlockSpec((feat_dim, C), lambda bi, hi: (0, 0)),
                pl.BlockSpec((feat_dim, 1), lambda bi, hi: (0, 0)),
                pl.BlockSpec((feat_dim, ncls_pad), lambda bi, hi: (0, 0)),
                pl.BlockSpec((1, ncls_pad), lambda bi, hi: (0, 0)),
            ],
            out_specs=pl.BlockSpec((TB, ncls_pad), lambda bi, hi: (bi, 0)),
            scratch_shapes=[pltpu.VMEM((TB, feat_dim, chunk), jnp.float32)],
        ),
        compiler_params=pltpu.CompilerParams(
            dimension_semantics=("parallel", "arbitrary"),
            vmem_limit_bytes=32 * 1024 * 1024),
    )(x_pix, w1b, b1c, w2t, b2p)

    # Slice off batch / class padding.
    return out[:B, :num_classes]


def reference_forward(x_nchw, w1, b1, w2, b2):
    """Pure-JAX reference of FineTuningModel.forward (synthetic backbone)."""
    B, C, H, W = x_nchw.shape
    x = x_nchw.reshape(B, C, H * W)
    h = jnp.maximum(jnp.einsum("fc,bcp->bfp", w1, x) + b1[None, :, None], 0.0)
    feat = jnp.mean(h, axis=-1)             # global average pool -> [B, FEAT]
    return feat @ w2.T + b2                 # nn.Linear(FEAT, NUM_CLASSES)


if __name__ == "__main__":
    FEAT = 32          # backbone.output_dim / final_feat_dim (small stand-in)
    NUM_CLASSES = 10   # num_classes (small stand-in for 1000)

    key = jax.random.PRNGKey(0)
    kx, k1, k2, k3, k4, kx2, kx3 = jax.random.split(key, 7)

    # Deterministic synthetic parameters (no checkpoint load).
    # TODO(synk): real ResNet10/backbone conv stack not ported; synthetic
    # 1x1-conv + ReLU + global-average-pool backbone stands in for backbone(x).
    w1 = jax.random.normal(k1, (FEAT, 3), dtype=jnp.float32) * 0.1
    b1 = jax.random.normal(k2, (FEAT,), dtype=jnp.float32) * 0.01
    w2 = jax.random.normal(k3, (NUM_CLASSES, FEAT), dtype=jnp.float32) * 0.1
    b2 = jax.random.normal(k4, (NUM_CLASSES,), dtype=jnp.float32) * 0.01

    TOL = dict(atol=5e-3, rtol=5e-3)   # bf16 pixel + conv-weight storage

    # Config 1: B=2 (TB=B, no batch padding), single spatial tile/chunk.
    B, C, H, W = 2, 3, 16, 16
    x = jax.random.normal(kx, (B, C, H, W), dtype=jnp.float32)
    logits = finetuning_model_forward(x, w1, b1, w2, b2)
    jax.block_until_ready(logits)
    ref = reference_forward(x, w1, b1, w2, b2)
    assert logits.shape == (B, NUM_CLASSES)
    assert jnp.allclose(logits, ref, **TOL)

    # Config 2: B=5, 32x32 images, 2 HW grid steps (exercises the pl.when
    # init/accumulate/finalize path) and 4 in-kernel chunks (fori_loop path).
    B2, H2, W2 = 5, 3, 32
    x2 = jax.random.normal(kx2, (B2, 3, 32, 32), dtype=jnp.float32)
    logits2 = finetuning_model_forward(x2, w1, b1, w2, b2,
                                       hw_tile=512, chunk=128)
    jax.block_until_ready(logits2)
    ref2 = reference_forward(x2, w1, b1, w2, b2)
    assert logits2.shape == (B2, NUM_CLASSES)
    assert jnp.allclose(logits2, ref2, **TOL)

    # Config 3: 20x20 images (HW=400, not a multiple of 128) exercises the
    # zero-padded spatial tail + fc-bias correction path.
    B3 = 3
    x3 = jax.random.normal(kx3, (B3, 3, 20, 20), dtype=jnp.float32)
    logits3 = finetuning_model_forward(x3, w1, b1, w2, b2)
    jax.block_until_ready(logits3)
    ref3 = reference_forward(x3, w1, b1, w2, b2)
    assert logits3.shape == (B3, NUM_CLASSES)
    assert jnp.allclose(logits3, ref3, **TOL)

    # TODO(synk): fine_tune() (SGD loop, CrossEntropyLoss, TripleBranchModule,
    # topk eval) is host-side training orchestration, not forward(); not ported.
    print("KERNEL_OK")
</pallas_src>

<mosaic_0001>
module attributes {stable_mosaic.version = 11 : i64} {
  func.func @_finetune_fwd_kernel(%arg0: i32, %arg1: i32, %arg2: memref<2x3x256xbf16, #tpu.memory_space<vmem>>, %arg3: memref<32x3xbf16, #tpu.memory_space<vmem>>, %arg4: memref<32x1xf32, #tpu.memory_space<vmem>>, %arg5: memref<32x128xf32, #tpu.memory_space<vmem>>, %arg6: memref<1x128xf32, #tpu.memory_space<vmem>>, %arg7: memref<2x128xf32, #tpu.memory_space<vmem>>, %arg8: memref<2x32x256xf32, #tpu.memory_space<vmem>>) attributes {dimension_semantics = [#tpu.dimension_semantics<parallel>, #tpu.dimension_semantics<arbitrary>], iteration_bounds = array<i64: 1, 1>, scalar_prefetch = 0 : i64, scratch_operands = 1 : i64, tpu.core_type = #tpu.core_type<tc>, window_params = [{transform_indices = @transform_0, window_bounds = array<i64: 2, 3, 256>}, {pipeline_mode = #tpu.pipeline_mode<synchronous>, transform_indices = @transform_1, window_bounds = array<i64: 32, 3>}, {pipeline_mode = #tpu.pipeline_mode<synchronous>, transform_indices = @transform_2, window_bounds = array<i64: 32, 1>}, {pipeline_mode = #tpu.pipeline_mode<synchronous>, transform_indices = @transform_3, window_bounds = array<i64: 32, 128>}, {pipeline_mode = #tpu.pipeline_mode<synchronous>, transform_indices = @transform_4, window_bounds = array<i64: 1, 128>}, {transform_indices = @transform_5, window_bounds = array<i64: 2, 128>}]} {
    %c0_i32 = arith.constant 0 : i32
    %0 = arith.cmpi eq, %arg1, %c0_i32 : i32
    %1 = arith.extui %0 : i1 to i32
    %c0_i32_0 = arith.constant 0 : i32
    %2 = arith.cmpi ne, %1, %c0_i32_0 : i32
    scf.if %2 {
      %cst_30 = arith.constant 0.000000e+00 : f32
      %44 = vector.broadcast %cst_30 : f32 to vector<2x32x256xf32>
      %c0_31 = arith.constant 0 : index
      %c0_32 = arith.constant 0 : index
      %c0_33 = arith.constant 0 : index
      %45 = vector.load %arg8[%c0_31, %c0_32, %c0_33] : memref<2x32x256xf32, #tpu.memory_space<vmem>>, vector<2x32x256xf32>
      tpu.vector_store %arg8[%c0_31, %c0_32, %c0_33], %44 {strides = array<i32>} : memref<2x32x256xf32, #tpu.memory_space<vmem>>, vector<2x32x256xf32>,
    } else {
    }
    %c0 = arith.constant 0 : index
    %c0_1 = arith.constant 0 : index
    %3 = vector.load %arg3[%c0, %c0_1] : memref<32x3xbf16, #tpu.memory_space<vmem>>, vector<32x3xbf16>
    %c0_2 = arith.constant 0 : index
    %c0_3 = arith.constant 0 : index
    %4 = vector.load %arg4[%c0_2, %c0_3] : memref<32x1xf32, #tpu.memory_space<vmem>>, vector<32x1xf32>
    %5 = vector.shape_cast %4 : vector<32x1xf32> to vector<32x1xf32>
    %6 = vector.broadcast %5 : vector<32x1xf32> to vector<32x256xf32>
    %cst = arith.constant 0.000000e+00 : f32
    %7 = vector.broadcast %cst : f32 to vector<32x256xf32>
    %c0_i32_4 = arith.constant 0 : i32
    %c256_i32 = arith.constant 256 : i32
    %8 = arith.muli %c0_i32_4, %c256_i32 : i32
    %9 = tpu.assume_multiple %8, 256 : i32
    %c0_5 = arith.constant 0 : index
    %c0_6 = arith.constant 0 : index
    %10 = arith.index_cast %9 : i32 to index
    %11 = vector.load %arg2[%c0_5, %c0_6, %10] : memref<2x3x256xbf16, #tpu.memory_space<vmem>>, vector<1x3x256xbf16>
    %12 = vector.shape_cast %11 : vector<1x3x256xbf16> to vector<3x256xbf16>
    %cst_7 = arith.constant dense<0.000000e+00> : vector<32x256xf32>
    %13 = tpu.matmul %3, %12, %cst_7 {dimension_numbers = #tpu.dot_dimension_numbers<[1], [0], [0], [1], [0, 0, 1, 1], [], []>} : vector<32x3xbf16>, vector<3x256xbf16>, vector<32x256xf32> -> vector<32x256xf32>
    %14 = arith.addf %13, %6 : vector<32x256xf32>
    %cst_8 = arith.constant 0.000000e+00 : f32
    %15 = vector.broadcast %cst_8 : f32 to vector<32x256xf32>
    %16 = arith.maximumf %14, %15 : vector<32x256xf32>
    %17 = arith.addf %7, %16 : vector<32x256xf32>
    %c1_i32 = arith.constant 1 : i32
    %c0_9 = arith.constant 0 : index
    %c0_10 = arith.constant 0 : index
    %c0_11 = arith.constant 0 : index
    %18 = vector.load %arg8[%c0_9, %c0_10, %c0_11] : memref<2x32x256xf32, #tpu.memory_space<vmem>>, vector<1x32x256xf32>
    %19 = vector.shape_cast %18 : vector<1x32x256xf32> to vector<32x256xf32>
    %20 = arith.addf %19, %17 : vector<32x256xf32>
    %c0_12 = arith.constant 0 : index
    %c0_13 = arith.constant 0 : index
    %c0_14 = arith.constant 0 : index
    %21 = vector.load %arg8[%c0_12, %c0_13, %c0_14] : memref<2x32x256xf32, #tpu.memory_space<vmem>>, vector<1x32x256xf32>
    %22 = vector.shape_cast %21 : vector<1x32x256xf32> to vector<32x256xf32>
    %23 = vector.shape_cast %20 : vector<32x256xf32> to vector<1x32x256xf32>
    tpu.vector_store %arg8[%c0_12, %c0_13, %c0_14], %23 {strides = array<i32>} : memref<2x32x256xf32, #tpu.memory_space<vmem>>, vector<1x32x256xf32>,
    %cst_15 = arith.constant 0.000000e+00 : f32
    %24 = vector.broadcast %cst_15 : f32 to vector<32x256xf32>
    %c0_i32_16 = arith.constant 0 : i32
    %c256_i32_17 = arith.constant 256 : i32
    %25 = arith.muli %c0_i32_16, %c256_i32_17 : i32
    %26 = tpu.assume_multiple %25, 256 : i32
    %c1 = arith.constant 1 : index
    %c0_18 = arith.constant 0 : index
    %27 = arith.index_cast %26 : i32 to index
    %28 = vector.load %arg2[%c1, %c0_18, %27] : memref<2x3x256xbf16, #tpu.memory_space<vmem>>, vector<1x3x256xbf16>
    %29 = vector.shape_cast %28 : vector<1x3x256xbf16> to vector<3x256xbf16>
    %cst_19 = arith.constant dense<0.000000e+00> : vector<32x256xf32>
    %30 = tpu.matmul %3, %29, %cst_19 {dimension_numbers = #tpu.dot_dimension_numbers<[1], [0], [0], [1], [0, 0, 1, 1], [], []>} : vector<32x3xbf16>, vector<3x256xbf16>, vector<32x256xf32> -> vector<32x256xf32>
    %31 = arith.addf %30, %6 : vector<32x256xf32>
    %cst_20 = arith.constant 0.000000e+00 : f32
    %32 = vector.broadcast %cst_20 : f32 to vector<32x256xf32>
    %33 = arith.maximumf %31, %32 : vector<32x256xf32>
    %34 = arith.addf %24, %33 : vector<32x256xf32>
    %c1_i32_21 = arith.constant 1 : i32
    %c1_22 = arith.constant 1 : index
    %c0_23 = arith.constant 0 : index
    %c0_24 = arith.constant 0 : index
    %35 = vector.load %arg8[%c1_22, %c0_23, %c0_24] : memref<2x32x256xf32, #tpu.memory_space<vmem>>, vector<1x32x256xf32>
    %36 = vector.shape_cast %35 : vector<1x32x256xf32> to vector<32x256xf32>
    %37 = arith.addf %36, %34 : vector<32x256xf32>
    %c1_25 = arith.constant 1 : index
    %c0_26 = arith.constant 0 : index
    %c0_27 = arith.constant 0 : index
    %38 = vector.load %arg8[%c1_25, %c0_26, %c0_27] : memref<2x32x256xf32, #tpu.memory_space<vmem>>, vector<1x32x256xf32>
    %39 = vector.shape_cast %38 : vector<1x32x256xf32> to vector<32x256xf32>
    %40 = vector.shape_cast %37 : vector<32x256xf32> to vector<1x32x256xf32>
    tpu.vector_store %arg8[%c1_25, %c0_26, %c0_27], %40 {strides = array<i32>} : memref<2x32x256xf32, #tpu.memory_space<vmem>>, vector<1x32x256xf32>,
    %c0_i32_28 = arith.constant 0 : i32
    %41 = arith.cmpi eq, %arg1, %c0_i32_28 : i32
    %42 = arith.extui %41 : i1 to i32
    %c0_i32_29 = arith.constant 0 : i32
    %43 = arith.cmpi ne, %42, %c0_i32_29 : i32
    scf.if %43 {
      %c0_30 = arith.constant 0 : index
      %c0_31 = arith.constant 0 : index
      %c0_32 = arith.constant 0 : index
      %44 = vector.load %arg8[%c0_30, %c0_31, %c0_32] : memref<2x32x256xf32, #tpu.memory_space<vmem>>, vector<2x32x256xf32>
      %cst_33 = arith.constant dense<0.000000e+00> : vector<2x32xf32>
      %45 = vector.multi_reduction <add>, %44, %cst_33 [2] : vector<2x32x256xf32> to vector<2x32xf32>
      %cst_34 = arith.constant 3.906250e-03 : f32
      %46 = vector.broadcast %cst_34 : f32 to vector<2x32xf32>
      %47 = arith.mulf %45, %46 : vector<2x32xf32>
      %c0_35 = arith.constant 0 : index
      %c0_36 = arith.constant 0 : index
      %48 = vector.load %arg5[%c0_35, %c0_36] : memref<32x128xf32, #tpu.memory_space<vmem>>, vector<32x128xf32>
      %cst_37 = arith.constant dense<0.000000e+00> : vector<2x128xf32>
      %49 = tpu.matmul %47, %48, %cst_37 {dimension_numbers = #tpu.dot_dimension_numbers<[1], [0], [0], [1], [0, 0, 1, 1], [], []>} : vector<2x32xf32>, vector<32x128xf32>, vector<2x128xf32> -> vector<2x128xf32>
      %c0_38 = arith.constant 0 : index
      %c0_39 = arith.constant 0 : index
      %50 = vector.load %arg6[%c0_38, %c0_39] : memref<1x128xf32, #tpu.memory_space<vmem>>, vector<1x128xf32>
      %51 = vector.broadcast %50 : vector<1x128xf32> to vector<2x128xf32>
      %52 = arith.addf %49, %51 : vector<2x128xf32>
      %c0_40 = arith.constant 0 : index
      %c0_41 = arith.constant 0 : index
      %53 = vector.load %arg7[%c0_40, %c0_41] : memref<2x128xf32, #tpu.memory_space<vmem>>, vector<2x128xf32>
      tpu.vector_store %arg7[%c0_40, %c0_41], %52 {strides = array<i32>} : memref<2x128xf32, #tpu.memory_space<vmem>>, vector<2x128xf32>,
    } else {
    }
    return
  }
  func.func @transform_0(%arg0: i32, %arg1: i32) -> (i32, i32, i32) {
    %c0_i32 = arith.constant 0 : i32
    %c0_i32_0 = arith.constant 0 : i32
    return %arg0, %c0_i32, %arg1 : i32, i32, i32
  }
  func.func @transform_1(%arg0: i32, %arg1: i32) -> (i32, i32) {
    %c0_i32 = arith.constant 0 : i32
    %c0_i32_0 = arith.constant 0 : i32
    %c0_i32_1 = arith.constant 0 : i32
    return %c0_i32, %c0_i32_0 : i32, i32
  }
  func.func @transform_2(%arg0: i32, %arg1: i32) -> (i32, i32) {
    %c0_i32 = arith.constant 0 : i32
    %c0_i32_0 = arith.constant 0 : i32
    %c0_i32_1 = arith.constant 0 : i32
    return %c0_i32, %c0_i32_0 : i32, i32
  }
  func.func @transform_3(%arg0: i32, %arg1: i32) -> (i32, i32) {
    %c0_i32 = arith.constant 0 : i32
    %c0_i32_0 = arith.constant 0 : i32
    %c0_i32_1 = arith.constant 0 : i32
    return %c0_i32, %c0_i32_0 : i32, i32
  }
  func.func @transform_4(%arg0: i32, %arg1: i32) -> (i32, i32) {
    %c0_i32 = arith.constant 0 : i32
    %c0_i32_0 = arith.constant 0 : i32
    %c0_i32_1 = arith.constant 0 : i32
    return %c0_i32, %c0_i32_0 : i32, i32
  }
  func.func @transform_5(%arg0: i32, %arg1: i32) -> (i32, i32) {
    %c0_i32 = arith.constant 0 : i32
    %c0_i32_0 = arith.constant 0 : i32
    return %arg0, %c0_i32 : i32, i32
  }
}

</mosaic_0001>

<bundles_post_ra>
// kernel: tpu_custom_call.1
= control target key start
LH: loop header
LB: loop body
LE: loop exit
PB: predicated region body
PF: predicated region fallthrough
CT: control target
= control target key end

     0   :  { %vm97_vm0 = vcmask 1040384   ;;  %vm98_vm1 = vcmask 1041408   ;;  %v587_v3 = vmov 65535   ;;  %v588_v6 = vmov 0   ;;  %s674_s0 = inlined_call_operand.vmem [shape: bf16[2,3,256], index: 0, kind: input, shape index: {}]   ;;  %s675_s1 = inlined_call_operand.vmem [shape: bf16[32,3], index: 1, kind: input, shape index: {}]   ;;  %s676_s2 = inlined_call_operand.vmem [shape: f32[32,1], index: 2, kind: input, shape index: {}]   ;;  %s677_s3 = inlined_call_operand.vmem [shape: f32[32,128], index: 3, kind: input, shape index: {}]   ;;  %s678_s4 = inlined_call_operand.vmem [shape: f32[1,128], index: 4, kind: input, shape index: {}]   ;;  %s679_s5 = inlined_call_operand.hbm [shape: f32[2,128], index: 5, kind: output, shape index: {}]  }
   0x1   :  { %v522_v0 = vld.sshfl [vmem:[%s674_s0] sm:$0x33 pattern:$0x76325410]  ;;  %v99_v4 = vsel %vm97_vm0, 4294967295, %v587_v3  ;;  %139 = vmatprep.mubr.bf16.mxu0 %v588_v6  ;;  %251 = vmatprep.mubr.bf16.mxu1 %v588_v6  ;;  %v48_v13 = vld [vmem:[%s676_s2 + $0x10] sm:$0xff] }
   0x2   :  { %v89_v1 = vcombine.high %v522_v0, %v522_v0  ;;  %v526_v2 = vld.sshfl [vmem:[%s674_s0 + $0x4] sm:$0x33 pattern:$0x76325410]  ;;  %v100_v7 = vsel %vm98_vm1, %v99_v4, 0  ;;  %559 = vset.pattern.permute.xlu0 %v588_v6  ;;  %560 = vset.pattern.permute.xlu1 %v588_v6 }
   0x3   :  { %v212_v5 = vcombine.high %v526_v2, %v526_v2  ;;  %v102_v10 = vand.u32 %v522_v0, %v100_v7  ;;  %v214_v11 = vand.u32 %v526_v2, %v100_v7  ;;  %v46_v12 = vld [vmem:[%s676_s2] sm:$0xff] }
   0x4   :  { %v105_v8 = vand.u32 %v100_v7, %v89_v1  ;;  %52 = vperm.xlu0 %559, %v46_v12  }
   0x5   :  { %v217_v9 = vand.u32 %v212_v5, %v100_v7 }
   0x6   :  { %10 = vsyncpa [#allocation4], 0  ;;  %107 = vmatprep.subr.bf16.mxu0 %v105_v8  ;;  %v561_v14 = vld [vmem:[%s675_s1] sm:$0xff]   ;;  %v47_v15 = vld [vmem:[%s676_s2 + $0x8] sm:$0xff]  ;;  %vm90_vm2 = vcmask 23552   ;;  %62 = vperm.xlu1 %560, %v48_v13   ;;  %vm590_vm3 = vmmov 0  }
   0x7   :  { %219 = vmatprep.subr.bf16.mxu1 %v217_v9  ;;  %108 = vmatpush1.bf16.msra.mxu0 %v102_v10  ;;  %v49_v16 = vld [vmem:[%s676_s2 + $0x18] sm:$0xff]  ;;  %v562_v17 = vld [vmem:[%s675_s1 + $0x8] sm:$0xff]   ;;  %vm394_vm4 = vcmask 130112   ;;  %vm401_vm5 = vcmask 195712   ;;  %vm408_vm6 = vcmask 261312   ;;  %vm429_vm7 = vcmask 1041409  }
   0x8   :  { %220 = vmatpush1.bf16.msra.mxu1 %v214_v11  ;;  %57 = vperm.xlu0 %559, %v47_v15   ;;  %v365_v15 = vld [vmem:[%s677_s3 + $0x8] sm:$0xff]  ;;  %vm431_vm8 = vcmask 261120   ;;  %s592_s15 = smov [#allocation3]  }
   0x9   :  { %s511_s16 = sshll.u32 %s592_s15, 4  ;;  %s512_s16 = int_to_ptr.vmem [resolvable:$true] %s511_s16 }
   0xa   :  { %523 = vmatmul.mubr.msk.bf16.vlgmr.msra.gmra.mrb[0].mxu0 %vm90_vm2, %v561_v14  ;;  %67 = vperm.xlu1 %560, %v49_v16   ;;  %v589_v16 = vmov 0.0|0.0   ;;  %s563_s17 = scalar_lea.vmem %s512_s16, 32  ;;  %p568_p1 = scmp.lt.s32.totalorder %s512_s16, %s512_s16 }
   0xb   :  { %527 = vmatmul.mubr.msk.bf16.vlgmr.msra.gmra.mrb[0].mxu1 %vm90_vm2, %v561_v14  ;;  %149 = vmatprep.mubr.bf16.mxu0 %v588_v6  ;;  %v364_v14 = vld [vmem:[%s677_s3] sm:$0xff]  ;;  %p564_p0 = scmp.ne.s32.totalorder %s512_s16, %s563_s17  ;;  %p569_p2 = scmp.lt.s32.totalorder %s563_s17, %s563_s17 }
   0xc   :  { %261 = vmatprep.mubr.bf16.mxu1 %v588_v6  ;;  %547 = vmatprep.subr.bf16.mxu0 %v589_v16 }
   0xd   :  { %p570_p3 = por %p569_p2, %p568_p1 }
   0xf   :  { %p571_p4 = pnand %p570_p3, %p564_p0 }
  0x12   :  { %524 = vmatmul.mubr.msk.bf16.gmra.mrb[4].mxu0 %vm90_vm2, %v562_v17 }
  0x13   :  { %528 = vmatmul.mubr.msk.bf16.gmra.mrb[4].mxu1 %vm90_vm2, %v562_v17  ;;  %v548_v17 = vpack.c.bf16 %v365_v15, %v364_v14 }
  0x15   :  { %549 = vmatpush3.bf16.msra.mxu0 %v548_v17 }
  0x16   :  { %550 = vmatprep.subr.bf16.mxu0 %v589_v16 }
  0x83   :  { %v53_v18 = vpop.permute.xlu0 %52 }
  0x85   :  { %v63_v20 = vpop.permute.xlu1 %62 }
  0x87   :  { %v58_v19 = vpop.permute.xlu0 %57 }
  0x89   :  { %v68_v47 = vpop.permute.xlu1 %67 }
  0xdd   :  { %v141_v21 = vpop.f32.mrb[0].mxu0 }
  0xde   :  { %v253_v22 = vpop.f32.mrb[0].mxu1  ;;  %v142_v23 = vadd.f32 %v141_v21, %v53_v18  ;;  %v143_v25 = vpop.f32.mrb[1].mxu0  ;;  %v591_v21 = vmov 0.0  }
  0xdf   :  { %v254_v24 = vadd.f32 %v253_v22, %v53_v18  ;;  %v255_v26 = vpop.f32.mrb[1].mxu1  ;;  %v144_v27 = vadd.f32 %v143_v25, %v53_v18  ;;  %v145_v29 = vpop.f32.mrb[2].mxu0  ;;  %544 = vmatprep.mubr.msk.f32.mxu0 %vm590_vm3, %v591_v21  ;;  %v383_v22 = vlaneseq }
  0xe0   :  { %v256_v28 = vadd.f32 %v255_v26, %v53_v18  ;;  %v257_v30 = vpop.f32.mrb[2].mxu1  ;;  %v160_v31 = vmax.f32 %v142_v23, 0.0  ;;  %v146_v33 = vadd.f32 %v145_v29, %v58_v19  ;;  %v147_v35 = vpop.f32.mrb[3].mxu0  ;;  %v366_v18 = vld [vmem:[%s677_s3 + $0x10] sm:$0xff] }
  0xe1   :  { %v272_v32 = vmax.f32 %v254_v24, 0.0  ;;  %v258_v34 = vadd.f32 %v257_v30, %v58_v19  ;;  %v259_v36 = vpop.f32.mrb[3].mxu1  ;;  %v161_v37 = vmax.f32 %v144_v27, 0.0  ;;  %v148_v39 = vadd.f32 %v147_v35, %v58_v19 }
  0xe2   :  { %v273_v38 = vmax.f32 %v256_v28, 0.0  ;;  %v260_v40 = vadd.f32 %v259_v36, %v58_v19  ;;  %v162_v41 = vmax.f32 %v146_v33, 0.0  ;;  %v367_v19 = vld [vmem:[%s677_s3 + $0x18] sm:$0xff]  ;;  %v384_v24 = vand.u32 127, %v383_v22 }
  0xe3   :  { %v274_v42 = vmax.f32 %v258_v34, 0.0  ;;  %v163_v43 = vmax.f32 %v148_v39, 0.0  ;;  %v332_v45 = vadd.f32 %v161_v37, %v160_v31  ;;  %v386_v28 = vshrl.u32 %v383_v22, 7 }
  0xe4   :  { %v275_v44 = vmax.f32 %v260_v40, 0.0  ;;  %v344_v46 = vadd.f32 %v273_v38, %v272_v32  ;;  %v389_v27 = vadd.s32 4294967288, %v384_v24  ;;  %v396_v29 = vadd.s32 4294967280, %v384_v24 }
  0xe5   :  { %v151_v48 = vpop.f32.mrb[4].mxu0  ;;  %333 = vadd.xlane.f32.xlu0 %v332_v45  ;;  %v335_v50 = vadd.f32 %v163_v43, %v162_v41  ;;  %v403_v32 = vadd.s32 4294967272, %v384_v24  ;;  %v387_v36 = vsub.s32 %v384_v24, %v386_v28 }
  0xe6   :  { %v263_v49 = vpop.f32.mrb[4].mxu1  ;;  %v347_v51 = vadd.f32 %v275_v44, %v274_v42  ;;  %v152_v52 = vadd.f32 %v151_v48, %v63_v20  ;;  %v153_v53 = vpop.f32.mrb[5].mxu0  ;;  %v392_v33 = vsub.s32 %v389_v27, %v386_v28  ;;  %v399_v37 = vsub.s32 %v396_v29, %v386_v28 }
  0xe7   :  { %v264_v54 = vadd.f32 %v263_v49, %v63_v20  ;;  %v265_v55 = vpop.f32.mrb[5].mxu1  ;;  %v154_v56 = vadd.f32 %v153_v53, %v63_v20  ;;  %336 = vadd.xlane.f32.xlu1 %v335_v50  ;;  %v155_v58 = vpop.f32.mrb[6].mxu0  ;;  %v406_v39 = vsub.s32 %v403_v32, %v386_v28 }
  0xe8   :  { %v266_v57 = vadd.f32 %v265_v55, %v63_v20  ;;  %v267_v59 = vpop.f32.mrb[6].mxu1  ;;  %v164_v60 = vmax.f32 %v152_v52, 0.0  ;;  %v157_v62 = vpop.f32.mrb[7].mxu0  ;;  %v156_v0 = vadd.f32 %v155_v58, %v68_v47  ;;  %v551_v20 = vpack.c.bf16 %v367_v19, %v366_v18 }
  0xe9   :  { %v276_v61 = vmax.f32 %v264_v54, 0.0  ;;  %v269_v63 = vpop.f32.mrb[7].mxu1  ;;  %v268_v1 = vadd.f32 %v267_v59, %v68_v47  ;;  %v165_v2 = vmax.f32 %v154_v56, 0.0  ;;  %v158_v4 = vadd.f32 %v157_v62, %v68_v47  ;;  %345 = vadd.xlane.f32.xlu0 %v344_v46 }
  0xea   :  { %v277_v3 = vmax.f32 %v266_v57, 0.0  ;;  %v270_v5 = vadd.f32 %v269_v63, %v68_v47  ;;  %v166_v6 = vmax.f32 %v156_v0, 0.0  ;;  %552 = vmatpush3.bf16.msra.mxu0 %v551_v20  ;;  %v529_v63 = vld [vmem:[%s678_s4] ss:$0 sm:$0xff] }
  0xeb   :  { %v278_v7 = vmax.f32 %v268_v1, 0.0  ;;  %v167_v8 = vmax.f32 %v158_v4, 0.0  ;;  %v338_v10 = vadd.f32 %v165_v2, %v164_v60 }
  0xec   :  { %v279_v9 = vmax.f32 %v270_v5, 0.0  ;;  %v350_v11 = vadd.f32 %v277_v3, %v276_v61 }
  0xed   :  { %339 = vadd.xlane.f32.xlu1 %v338_v10  ;;  %348 = vadd.xlane.f32.xlu0 %v347_v51  ;;  %v341_v12 = vadd.f32 %v167_v8, %v166_v6 }
  0xee   :  { %v353_v13 = vadd.f32 %v279_v9, %v278_v7 }
  0xf1   :  { %342 = vadd.xlane.f32.xlu1 %v341_v12  ;;  %351 = vadd.xlane.f32.xlu0 %v350_v11 }
  0xf5   :  { %354 = vadd.xlane.f32.xlu0 %v353_v13 }
 0x172   :  { %v334_v23 = vpop.xlane.xlu0 %333 }
 0x173   :  { %v356_v42 = vmul.f32 0.00390625, %v334_v23 }
 0x174   :  { %v337_v25 = vpop.xlane.xlu1 %336 }
 0x175   :  { %v357_v34 = vmul.f32 0.00390625, %v337_v25  ;;  %v388_v51 = vrot.slane %v356_v42, %v387_v36 }
 0x176   :  { %v346_v26 = vpop.xlane.xlu0 %345 }
 0x177   :  { %v360_v43 = vmul.f32 0.00390625, %v346_v26  ;;  %v393_v46 = vrot.slane %v357_v34, %v392_v33 }
 0x179   :  { %v413_v52 = vrot.slane %v360_v43, %v387_v36  ;;  %v395_v55 = vsel %vm394_vm4, %v393_v46, %v388_v51 }
 0x17a   :  { %v340_v30 = vpop.xlane.xlu1 %339  ;;  %v349_v31 = vpop.xlane.xlu0 %348 }
 0x17b   :  { %v361_v35 = vmul.f32 0.00390625, %v349_v31  ;;  %v358_v38 = vmul.f32 0.00390625, %v340_v30 }
 0x17d   :  { %v417_v47 = vrot.slane %v361_v35, %v392_v33  ;;  %v400_v48 = vrot.slane %v358_v38, %v399_v37 }
 0x17e   :  { %v343_v40 = vpop.xlane.xlu1 %342  ;;  %v352_v41 = vpop.xlane.xlu0 %351 }
 0x17f   :  { %v359_v44 = vmul.f32 0.00390625, %v343_v40  ;;  %v362_v45 = vmul.f32 0.00390625, %v352_v41  ;;  %v418_v56 = vsel %vm394_vm4, %v417_v47, %v413_v52  ;;  %v402_v58 = vsel %vm401_vm5, %v400_v48, %v395_v55 }
 0x181   :  { %v422_v49 = vrot.slane %v362_v45, %v399_v37  ;;  %v407_v53 = vrot.slane %v359_v44, %v406_v39 }
 0x182   :  { %v355_v50 = vpop.xlane.xlu0 %354 }
 0x183   :  { %v363_v54 = vmul.f32 0.00390625, %v355_v50  ;;  %v423_v59 = vsel %vm401_vm5, %v422_v49, %v418_v56  ;;  %v409_v60 = vsel %vm408_vm6, %v407_v53, %v402_v58 }
 0x185   :  { %v427_v57 = vrot.slane %v363_v54, %v406_v39 }
 0x187   :  { %v428_v61 = vsel %vm408_vm6, %v427_v57, %v423_v59 }
 0x188   :  { %v430_v62 = vsel %vm429_vm7, %v428_v61, %v409_v60 }
 0x189   :  { %545 = vmatmul.mubr.msk.f32.vlgmr.msra.gmra.mrb[8].mxu0 %vm431_vm8, %v430_v62 }
 0x25c   :  { %v500_v0 = vpop.f32.mrb[8].mxu0 }
 0x25d   :  { %v501_v1 = vadd.f32 %v529_v63, %v500_v0  ;;  %v546_v2 = vpop.f32.mrb[9].mxu0 }
 0x25f   :  { %504 = vst [vmem:[#allocation3] sm:$0x3] %v501_v1 }
 0x260   :  { %574 = shalt.err (!%p571_p4)
}
 0x261   :  { %s575_s20 = scalar_lea.hbm %s679_s5, 32 }
 0x262   :  { %p576_p5 = scmp.ne.s32.totalorder %s679_s5, %s575_s20  ;;  %p579_p6 = scmp.lt.u32.totalorder %s575_s20, %s679_s5 }
 0x264   :  { %p581_p7 = pnand %p579_p6, %p576_p5 }
 0x266   :  { %584 = shalt.err (!%p581_p7)
}
 0x267   :  { %514 = dma.vmem_to_hbm [thread:$0]  %s512_s16, 32, %s679_s5, [#allocation4]  }
 0x268   :  { %585 = dma.done.wait [#allocation4], 32  }
 0x269   :  { %586 = vsyncadd [#allocation4], 4294967264 }
 0x26a   :  { %518 = vsyncpa [#allocation4], 1 }

</bundles_post_ra>
